<compile_context>
chip_gen: v6e
topology: v6e:2x2x1
jax: 0.10.0
libtpu: 0.0.40
codegen_flags: <defaults>
</compile_context>

<pallas_src>
import jax
import jax.numpy as jnp
from jax.experimental import pallas as pl
from jax.experimental.pallas import tpu as pltpu


# ----------------------------- Pallas kernel ------------------------------- #

def _fused_kernel(x16_ref, x4p_ref, x8_ref, b16_ref, w4_ref, b4_ref, out_ref):
    # 1/16 branch: conv(+folded BN) applied at 1/16 resolution and the bilinear
    # x2 upsample already folded into the wrapper (both exact rewrites);
    # remaining in-kernel work: bias + ReLU.
    y16 = jnp.maximum(x16_ref[...].astype(jnp.float32) + b16_ref[...], 0.0)   # (C8, tm)

    # 1/4 branch: 2x2 max-pool = elementwise max of the 4 window slabs (VPU),
    # then the 1x1 conv (+folded BN) as a bf16 MXU matmul over channels.
    x4 = jnp.maximum(jnp.maximum(x4p_ref[0], x4p_ref[1]),
                     jnp.maximum(x4p_ref[2], x4p_ref[3]))                     # (C4, tm) bf16
    y4 = jnp.dot(w4_ref[...], x4, preferred_element_type=jnp.float32)         # (C8, tm) f32
    y4 = jnp.maximum(y4 + b4_ref[...], 0.0)

    # Weighted fusion; x8 stays f32 (it carries the 0.5 weight), output f32.
    out_ref[...] = 0.5 * x8_ref[...] + 0.25 * y16 + 0.25 * y4


def _pick_row_tile(M, cap=8192):
    """Largest lane tile (multiple of 128) dividing M, capped, preferring >= 2
    grid steps along the pixel axis (pipeline overlap / megacore sharding)."""
    cands = [t for t in range(128, min(cap, M) + 1, 128) if M % t == 0]
    if not cands:
        return M                       # tiny problem: single full-extent block
    multi = [t for t in cands if M // t >= 2]
    return max(multi) if multi else max(cands)


def fused_upsample_downsample(x16, x4p, x8, b16, w4, b4):
    """Both branches in one call.
    x16: (NB, C8, M) bf16 | x4p: (NB, 4, C4, M) bf16 | x8: (NB, C8, M) f32
    b16/b4: (NB, C8, 1) f32 | w4: (NB, C8, C4) bf16.
    Returns (NB, C8, M) f32 (lane-dense)."""
    NB, C8, M = x16.shape
    C4 = x4p.shape[2]
    tm = _pick_row_tile(M)
    assert M % tm == 0
    return pl.pallas_call(
        _fused_kernel,
        out_shape=jax.ShapeDtypeStruct((NB, C8, M), jnp.float32),
        grid_spec=pltpu.PrefetchScalarGridSpec(
            num_scalar_prefetch=0,
            grid=(NB, M // tm),
            in_specs=[
                pl.BlockSpec((None, C8, tm),    lambda b, i: (b, 0, i)),     # upsampled conv16 (bf16)
                pl.BlockSpec((None, 4, C4, tm), lambda b, i: (b, 0, 0, i)),  # 2x2 pool windows (bf16)
                pl.BlockSpec((None, C8, tm),    lambda b, i: (b, 0, i)),     # 1/8 feature (f32)
                pl.BlockSpec((None, C8, 1),     lambda b, i: (b, 0, 0)),     # folded bias (16-branch)
                pl.BlockSpec((None, C8, C4),    lambda b, i: (b, 0, 0)),     # folded conv weight 4->8
                pl.BlockSpec((None, C8, 1),     lambda b, i: (b, 0, 0)),     # folded bias (4-branch)
            ],
            out_specs=pl.BlockSpec((None, C8, tm), lambda b, i: (b, 0, i)),
        ),
        compiler_params=pltpu.CompilerParams(
            dimension_semantics=("parallel", "parallel")),
    )(x16, x4p, x8, b16, w4, b4)


# ------------------------------ JAX glue ------------------------------------ #

def _axis_src_idx(out_size, in_size):
    """PyTorch Upsample(scale=2, bilinear, align_corners=False) index math."""
    o = jnp.arange(out_size, dtype=jnp.float32)
    src = jnp.maximum((o + 0.5) * (in_size / out_size) - 0.5, 0.0)
    i0 = jnp.floor(src).astype(jnp.int32)
    frac = src - i0.astype(jnp.float32)
    i0 = jnp.minimum(i0, in_size - 1)
    i1 = jnp.minimum(i0 + 1, in_size - 1)
    return i0, i1, frac


def fold_bn_into_conv(w, b, gamma, beta, mean, var, eps=1e-5):
    """1x1 conv weight w:(Cin,Cout), bias b:(Cout). BN eval mode, folded."""
    scale = gamma / jnp.sqrt(var + eps)
    return w * scale[None, :], (b - mean) * scale + beta


def prep_upsample_conv(feat16_nhwc, w16_fold):
    """Apply the BN-folded 1x1 conv (no bias) at 1/16 resolution, then the
    separable bilinear x2 upsample (W then H pass), packed channels-first:
    (C8, M) bf16 with M = B*(2H16)*(2W16).  Exactly equivalent to
    conv(upsample(x)) since a 1x1 conv commutes with bilinear interpolation."""
    B, H16, W16, _ = feat16_nhwc.shape
    H8, W8 = 2 * H16, 2 * W16
    C8 = w16_fold.shape[1]
    z = jnp.einsum('bhwc,cd->bhwd', feat16_nhwc, w16_fold)          # (B,H16,W16,C8)
    w0, w1, fw = _axis_src_idx(W8, W16)
    zw = ((1.0 - fw)[None, None, :, None] * z[:, :, w0, :]
          + fw[None, None, :, None] * z[:, :, w1, :])               # (B,H16,W8,C8)
    h0, h1, fh = _axis_src_idx(H8, H16)
    zu = ((1.0 - fh)[None, :, None, None] * zw[:, h0, :, :]
          + fh[None, :, None, None] * zw[:, h1, :, :])              # (B,H8,W8,C8)
    g = zu.reshape(B * H8 * W8, C8)
    return jnp.transpose(g, (1, 0)).astype(jnp.bfloat16)            # (C8, M)


def prep_pool_windows(feat4_nhwc):
    """(B,H4,W4,C4) -> (4, C4, M) bf16: the 4 elements of each 2x2 pool window,
    channels-first with 1/8-resolution pixels on the lane axis."""
    B, H4, W4, C4 = feat4_nhwc.shape
    H8, W8 = H4 // 2, W4 // 2
    x = feat4_nhwc.reshape(B, H8, 2, W8, 2, C4)
    x = jnp.transpose(x, (2, 4, 0, 1, 3, 5)).reshape(4, B * H8 * W8, C4)
    return jnp.transpose(x, (0, 2, 1)).astype(jnp.bfloat16)         # (4, C4, M)


def pack_branch(feat16, feat4, feat8, wc16, bc16, wc4, bc4):
    """Build the channels-first, lane-dense kernel operands for one branch."""
    B, H8, W8, C8 = feat8.shape
    M = B * H8 * W8
    x16 = prep_upsample_conv(feat16, wc16)                          # (C8,M)  bf16
    x4p = prep_pool_windows(feat4)                                  # (4,C4,M) bf16
    x8 = jnp.transpose(feat8.reshape(M, C8), (1, 0))                # (C8,M)  f32
    b16 = bc16.reshape(C8, 1).astype(jnp.float32)
    w4 = jnp.transpose(wc4, (1, 0)).astype(jnp.bfloat16)            # (C8,C4)
    b4 = bc4.reshape(C8, 1).astype(jnp.float32)
    return x16, x4p, x8, b16, w4, b4


def run_module(feat_c0_16, feat_c1_16, feat_c0_4, feat_c1_4, feat_c0_8, feat_c1_8,
               wc0, bc0, wc1, bc1, wc2, bc2, wc3, bc3):
    """Full module forward (both branches) with a single fused pallas_call."""
    B, H8, W8, C8 = feat_c0_8.shape
    p0 = pack_branch(feat_c0_16, feat_c0_4, feat_c0_8, wc0, bc0, wc2, bc2)
    p1 = pack_branch(feat_c1_16, feat_c1_4, feat_c1_8, wc1, bc1, wc3, bc3)
    stacked = tuple(jnp.stack([a, b]) for a, b in zip(p0, p1))
    out = fused_upsample_downsample(*stacked)                       # (2, C8, M)
    o0 = jnp.transpose(out[0], (1, 0)).reshape(B, H8, W8, C8)
    o1 = jnp.transpose(out[1], (1, 0)).reshape(B, H8, W8, C8)
    return (o0, o1), (p0, p1)


# ------------------------------ references ---------------------------------- #

def reference_packed(x16, x4p, x8, b16, w4, b4):
    """Replays exactly the kernel math (same bf16-quantized operands) in f32."""
    y16 = jnp.maximum(x16.astype(jnp.float32) + b16, 0.0)
    x4 = jnp.maximum(jnp.maximum(x4p[0], x4p[1]),
                     jnp.maximum(x4p[2], x4p[3])).astype(jnp.float32)
    y4 = jnp.maximum(
        jnp.einsum('ck,km->cm', w4.astype(jnp.float32), x4,
                   precision=jax.lax.Precision.HIGHEST) + b4, 0.0)
    return 0.5 * x8 + 0.25 * y16 + 0.25 * y4                        # (C8, M)


def reference_module(feat16, feat4, feat8, wc16, bc16, wc4, bc4):
    """Pure-f32 JAX replica of one branch of the PyTorch forward (NHWC)."""
    B, H16, W16, _ = feat16.shape
    H8, W8 = 2 * H16, 2 * W16
    w0, w1, fw = _axis_src_idx(W8, W16)
    h0, h1, fh = _axis_src_idx(H8, H16)
    xw = ((1 - fw)[None, None, :, None] * feat16[:, :, w0, :]
          + fw[None, None, :, None] * feat16[:, :, w1, :])
    up = ((1 - fh)[None, :, None, None] * xw[:, h0, :, :]
          + fh[None, :, None, None] * xw[:, h1, :, :])
    y16 = jnp.maximum(jnp.einsum('bhwc,cd->bhwd', up, wc16) + bc16, 0.0)
    B4, H4, W4, C4 = feat4.shape
    pooled = jnp.max(feat4.reshape(B4, H4 // 2, 2, W4 // 2, 2, C4), axis=(2, 4))
    y4 = jnp.maximum(jnp.einsum('bhwc,cd->bhwd', pooled, wc4) + bc4, 0.0)
    return 0.5 * feat8 + 0.25 * y16 + 0.25 * y4


# ------------------------------- main --------------------------------------- #

if __name__ == "__main__":
    # config (PyTorch module works in NCHW; features are handled channels-last here)
    d16, d8, d4 = 32, 16, 8          # d_model_16, d_model_8, d_model_4
    B, H8, W8 = 2, 16, 16
    H16, W16 = H8 // 2, W8 // 2
    H4, W4 = H8 * 2, W8 * 2

    key = jax.random.PRNGKey(0)
    ks = jax.random.split(key, 32)
    ki = iter(range(32))

    def nrm(shape, scale=0.1):
        return scale * jax.random.normal(ks[next(ki)], shape, dtype=jnp.float32)

    feat_c0_16 = nrm((B, H16, W16, d16), 1.0)
    feat_c1_16 = nrm((B, H16, W16, d16), 1.0)
    feat_c0_4 = nrm((B, H4, W4, d4), 1.0)
    feat_c1_4 = nrm((B, H4, W4, d4), 1.0)
    feat_c0_8 = nrm((B, H8, W8, d8), 1.0)
    feat_c1_8 = nrm((B, H8, W8, d8), 1.0)

    def make_conv_bn(cin, cout):
        w = nrm((cin, cout))
        b = nrm((cout,))
        gamma = 1.0 + nrm((cout,))
        beta = nrm((cout,))
        mean = nrm((cout,))
        var = 0.5 + jnp.abs(nrm((cout,), 1.0))
        return fold_bn_into_conv(w, b, gamma, beta, mean, var)

    wc0, bc0 = make_conv_bn(d16, d8)   # conv0 + bn0
    wc1, bc1 = make_conv_bn(d16, d8)   # conv1 + bn1
    wc2, bc2 = make_conv_bn(d4, d8)    # conv2 + bn2
    wc3, bc3 = make_conv_bn(d4, d8)    # conv3 + bn3

    (out_c0, out_c1), (packed_c0, packed_c1) = run_module(
        feat_c0_16, feat_c1_16, feat_c0_4, feat_c1_4, feat_c0_8, feat_c1_8,
        wc0, bc0, wc1, bc1, wc2, bc2, wc3, bc3)
    jax.block_until_ready((out_c0, out_c1))

    # strict check: same bf16-quantized operands, isolates the kernel itself
    rs_c0 = jnp.transpose(reference_packed(*packed_c0), (1, 0)).reshape(B, H8, W8, d8)
    rs_c1 = jnp.transpose(reference_packed(*packed_c1), (1, 0)).reshape(B, H8, W8, d8)
    # module-level check: full-f32 replica of the PyTorch forward
    rm_c0 = reference_module(feat_c0_16, feat_c0_4, feat_c0_8, wc0, bc0, wc2, bc2)
    rm_c1 = reference_module(feat_c1_16, feat_c1_4, feat_c1_8, wc1, bc1, wc3, bc3)

    assert out_c0.shape == (B, H8, W8, d8) and out_c1.shape == (B, H8, W8, d8)
    assert jnp.allclose(out_c0, rs_c0, atol=1e-4, rtol=1e-4)
    assert jnp.allclose(out_c1, rs_c1, atol=1e-4, rtol=1e-4)
    assert jnp.allclose(out_c0, rm_c0, atol=2e-2, rtol=2e-2)
    assert jnp.allclose(out_c1, rm_c1, atol=2e-2, rtol=2e-2)
    print("KERNEL_OK")
</pallas_src>

<mosaic_0001>
module attributes {stable_mosaic.version = 11 : i64} {
  func.func @_fused_kernel(%arg0: i32, %arg1: i32, %arg2: memref<1x16x256xbf16, #tpu.memory_space<vmem>>, %arg3: memref<1x4x8x256xbf16, #tpu.memory_space<vmem>>, %arg4: memref<1x16x256xf32, #tpu.memory_space<vmem>>, %arg5: memref<1x16x1xf32, #tpu.memory_space<vmem>>, %arg6: memref<1x16x8xbf16, #tpu.memory_space<vmem>>, %arg7: memref<1x16x1xf32, #tpu.memory_space<vmem>>, %arg8: memref<1x16x256xf32, #tpu.memory_space<vmem>>) attributes {dimension_semantics = [#tpu.dimension_semantics<parallel>, #tpu.dimension_semantics<parallel>], iteration_bounds = array<i64: 2, 2>, scalar_prefetch = 0 : i64, scratch_operands = 0 : i64, tpu.core_type = #tpu.core_type<tc>, window_params = [{transform_indices = @transform_0, window_bounds = array<i64: 1, 16, 256>}, {transform_indices = @transform_1, window_bounds = array<i64: 1, 4, 8, 256>}, {transform_indices = @transform_2, window_bounds = array<i64: 1, 16, 256>}, {transform_indices = @transform_3, window_bounds = array<i64: 1, 16, 1>}, {transform_indices = @transform_4, window_bounds = array<i64: 1, 16, 8>}, {transform_indices = @transform_5, window_bounds = array<i64: 1, 16, 1>}, {transform_indices = @transform_6, window_bounds = array<i64: 1, 16, 256>}]} {
    %c0 = arith.constant 0 : index
    %c0_0 = arith.constant 0 : index
    %c0_1 = arith.constant 0 : index
    %0 = vector.load %arg2[%c0, %c0_0, %c0_1] : memref<1x16x256xbf16, #tpu.memory_space<vmem>>, vector<1x16x256xbf16>
    %1 = vector.shape_cast %0 : vector<1x16x256xbf16> to vector<16x256xbf16>
    %2 = arith.extf %1 : vector<16x256xbf16> to vector<16x256xf32>
    %c0_2 = arith.constant 0 : index
    %c0_3 = arith.constant 0 : index
    %c0_4 = arith.constant 0 : index
    %3 = vector.load %arg5[%c0_2, %c0_3, %c0_4] : memref<1x16x1xf32, #tpu.memory_space<vmem>>, vector<1x16x1xf32>
    %4 = vector.shape_cast %3 : vector<1x16x1xf32> to vector<16x1xf32>
    %5 = vector.broadcast %4 : vector<16x1xf32> to vector<16x256xf32>
    %6 = arith.addf %2, %5 : vector<16x256xf32>
    %cst = arith.constant 0.000000e+00 : f32
    %7 = vector.broadcast %cst : f32 to vector<16x256xf32>
    %8 = arith.maximumf %6, %7 : vector<16x256xf32>
    %c0_5 = arith.constant 0 : index
    %c0_6 = arith.constant 0 : index
    %c0_7 = arith.constant 0 : index
    %c0_8 = arith.constant 0 : index
    %9 = vector.load %arg3[%c0_5, %c0_6, %c0_7, %c0_8] : memref<1x4x8x256xbf16, #tpu.memory_space<vmem>>, vector<1x1x8x256xbf16>
    %10 = vector.shape_cast %9 : vector<1x1x8x256xbf16> to vector<8x256xbf16>
    %c0_9 = arith.constant 0 : index
    %c1 = arith.constant 1 : index
    %c0_10 = arith.constant 0 : index
    %c0_11 = arith.constant 0 : index
    %11 = vector.load %arg3[%c0_9, %c1, %c0_10, %c0_11] : memref<1x4x8x256xbf16, #tpu.memory_space<vmem>>, vector<1x1x8x256xbf16>
    %12 = vector.shape_cast %11 : vector<1x1x8x256xbf16> to vector<8x256xbf16>
    %13 = arith.maximumf %10, %12 : vector<8x256xbf16>
    %c0_12 = arith.constant 0 : index
    %c2 = arith.constant 2 : index
    %c0_13 = arith.constant 0 : index
    %c0_14 = arith.constant 0 : index
    %14 = vector.load %arg3[%c0_12, %c2, %c0_13, %c0_14] : memref<1x4x8x256xbf16, #tpu.memory_space<vmem>>, vector<1x1x8x256xbf16>
    %15 = vector.shape_cast %14 : vector<1x1x8x256xbf16> to vector<8x256xbf16>
    %c0_15 = arith.constant 0 : index
    %c3 = arith.constant 3 : index
    %c0_16 = arith.constant 0 : index
    %c0_17 = arith.constant 0 : index
    %16 = vector.load %arg3[%c0_15, %c3, %c0_16, %c0_17] : memref<1x4x8x256xbf16, #tpu.memory_space<vmem>>, vector<1x1x8x256xbf16>
    %17 = vector.shape_cast %16 : vector<1x1x8x256xbf16> to vector<8x256xbf16>
    %18 = arith.maximumf %15, %17 : vector<8x256xbf16>
    %19 = arith.maximumf %13, %18 : vector<8x256xbf16>
    %c0_18 = arith.constant 0 : index
    %c0_19 = arith.constant 0 : index
    %c0_20 = arith.constant 0 : index
    %20 = vector.load %arg6[%c0_18, %c0_19, %c0_20] : memref<1x16x8xbf16, #tpu.memory_space<vmem>>, vector<1x16x8xbf16>
    %21 = vector.shape_cast %20 : vector<1x16x8xbf16> to vector<16x8xbf16>
    %cst_21 = arith.constant dense<0.000000e+00> : vector<16x256xf32>
    %22 = tpu.matmul %21, %19, %cst_21 {dimension_numbers = #tpu.dot_dimension_numbers<[1], [0], [0], [1], [0, 0, 1, 1], [], []>} : vector<16x8xbf16>, vector<8x256xbf16>, vector<16x256xf32> -> vector<16x256xf32>
    %c0_22 = arith.constant 0 : index
    %c0_23 = arith.constant 0 : index
    %c0_24 = arith.constant 0 : index
    %23 = vector.load %arg7[%c0_22, %c0_23, %c0_24] : memref<1x16x1xf32, #tpu.memory_space<vmem>>, vector<1x16x1xf32>
    %24 = vector.shape_cast %23 : vector<1x16x1xf32> to vector<16x1xf32>
    %25 = vector.broadcast %24 : vector<16x1xf32> to vector<16x256xf32>
    %26 = arith.addf %22, %25 : vector<16x256xf32>
    %cst_25 = arith.constant 0.000000e+00 : f32
    %27 = vector.broadcast %cst_25 : f32 to vector<16x256xf32>
    %28 = arith.maximumf %26, %27 : vector<16x256xf32>
    %c0_26 = arith.constant 0 : index
    %c0_27 = arith.constant 0 : index
    %c0_28 = arith.constant 0 : index
    %29 = vector.load %arg4[%c0_26, %c0_27, %c0_28] : memref<1x16x256xf32, #tpu.memory_space<vmem>>, vector<1x16x256xf32>
    %30 = vector.shape_cast %29 : vector<1x16x256xf32> to vector<16x256xf32>
    %cst_29 = arith.constant 5.000000e-01 : f32
    %31 = vector.broadcast %cst_29 : f32 to vector<16x256xf32>
    %32 = arith.mulf %31, %30 : vector<16x256xf32>
    %cst_30 = arith.constant 2.500000e-01 : f32
    %33 = vector.broadcast %cst_30 : f32 to vector<16x256xf32>
    %34 = arith.mulf %33, %8 : vector<16x256xf32>
    %35 = arith.addf %32, %34 : vector<16x256xf32>
    %cst_31 = arith.constant 2.500000e-01 : f32
    %36 = vector.broadcast %cst_31 : f32 to vector<16x256xf32>
    %37 = arith.mulf %36, %28 : vector<16x256xf32>
    %38 = arith.addf %35, %37 : vector<16x256xf32>
    %c0_32 = arith.constant 0 : index
    %c0_33 = arith.constant 0 : index
    %c0_34 = arith.constant 0 : index
    %39 = vector.load %arg8[%c0_32, %c0_33, %c0_34] : memref<1x16x256xf32, #tpu.memory_space<vmem>>, vector<1x16x256xf32>
    %40 = vector.shape_cast %39 : vector<1x16x256xf32> to vector<16x256xf32>
    %41 = vector.shape_cast %38 : vector<16x256xf32> to vector<1x16x256xf32>
    tpu.vector_store %arg8[%c0_32, %c0_33, %c0_34], %41 {strides = array<i32>} : memref<1x16x256xf32, #tpu.memory_space<vmem>>, vector<1x16x256xf32>,
    return
  }
  func.func @transform_0(%arg0: i32, %arg1: i32) -> (i32, i32, i32) {
    %c0_i32 = arith.constant 0 : i32
    %c0_i32_0 = arith.constant 0 : i32
    return %arg0, %c0_i32, %arg1 : i32, i32, i32
  }
  func.func @transform_1(%arg0: i32, %arg1: i32) -> (i32, i32, i32, i32) {
    %c0_i32 = arith.constant 0 : i32
    %c0_i32_0 = arith.constant 0 : i32
    %c0_i32_1 = arith.constant 0 : i32
    return %arg0, %c0_i32, %c0_i32_0, %arg1 : i32, i32, i32, i32
  }
  func.func @transform_2(%arg0: i32, %arg1: i32) -> (i32, i32, i32) {
    %c0_i32 = arith.constant 0 : i32
    %c0_i32_0 = arith.constant 0 : i32
    return %arg0, %c0_i32, %arg1 : i32, i32, i32
  }
  func.func @transform_3(%arg0: i32, %arg1: i32) -> (i32, i32, i32) {
    %c0_i32 = arith.constant 0 : i32
    %c0_i32_0 = arith.constant 0 : i32
    %c0_i32_1 = arith.constant 0 : i32
    return %arg0, %c0_i32, %c0_i32_0 : i32, i32, i32
  }
  func.func @transform_4(%arg0: i32, %arg1: i32) -> (i32, i32, i32) {
    %c0_i32 = arith.constant 0 : i32
    %c0_i32_0 = arith.constant 0 : i32
    %c0_i32_1 = arith.constant 0 : i32
    return %arg0, %c0_i32, %c0_i32_0 : i32, i32, i32
  }
  func.func @transform_5(%arg0: i32, %arg1: i32) -> (i32, i32, i32) {
    %c0_i32 = arith.constant 0 : i32
    %c0_i32_0 = arith.constant 0 : i32
    %c0_i32_1 = arith.constant 0 : i32
    return %arg0, %c0_i32, %c0_i32_0 : i32, i32, i32
  }
  func.func @transform_6(%arg0: i32, %arg1: i32) -> (i32, i32, i32) {
    %c0_i32 = arith.constant 0 : i32
    %c0_i32_0 = arith.constant 0 : i32
    return %arg0, %c0_i32, %arg1 : i32, i32, i32
  }
}

</mosaic_0001>

<bundles_post_ra>
// kernel: tpu_custom_call.1
= control target key start
LH: loop header
LB: loop body
LE: loop exit
PB: predicated region body
PF: predicated region fallthrough
CT: control target
= control target key end

     0   :  { %s1351_s0 = inlined_call_operand.vmem [shape: bf16[2,16,512], index: 0, kind: input, shape index: {}]   ;;  %s1352_s1 = inlined_call_operand.hbm [shape: bf16[2,4,8,512], index: 1, kind: input, shape index: {}]   ;;  %s1353_s2 = inlined_call_operand.hbm [shape: f32[2,16,512], index: 2, kind: input, shape index: {}]   ;;  %s1354_s3 = inlined_call_operand.vmem [shape: f32[2,16,1], index: 3, kind: input, shape index: {}]   ;;  %s1355_s4 = inlined_call_operand.vmem [shape: bf16[2,16,8], index: 4, kind: input, shape index: {}]   ;;  %s1356_s5 = inlined_call_operand.vmem [shape: f32[2,16,1], index: 5, kind: input, shape index: {}]   ;;  %s1357_s6 = inlined_call_operand.hbm [shape: f32[2,16,512], index: 6, kind: output, shape index: {}]  }
   0x1   :  { %1366 = sst [smem:[#allocation20_spill]] %s1351_s0 }
   0x2   :  { %1367 = sst [smem:[#allocation21_spill]] %s1352_s1 }
   0x3   :  { %1368 = sst [smem:[#allocation22_spill]] %s1357_s6 }
   0x4   :  { %11 = vsyncpa [#allocation4], 0 }
   0x5   :  { %13 = vsyncpa [#allocation4 + $0x1], 0 }
   0x6   :  { %14 = vsyncpa [#allocation7], 0 }
   0x7   :  { %16 = vsyncpa [#allocation7 + $0x1], 0 }
   0x8   :  { %17 = vsyncpa [#allocation5], 0 }
   0x9   :  { %19 = vsyncpa [#allocation5 + $0x1], 0  ;;  %s1128_s21 = smov 0   ;;  %s1130_s22 = smov 0  }
   0xa   :  { %s1132_s23 = smov 0   ;;  %s1134_s24 = smov 0  }
   0xb   :  { %s1136_s25 = smov 0   ;;  %s1138_s26 = smov 0  }
   0xc   :  { %s1140_s27 = smov 0   ;;  %s1142_s28 = smov 0  }
   0xd LB: > { %1369 = sst [smem:[#allocation12_spill]] %s1051_s21  ;;  %s796_s29 = sadd.s32 4294967295, %s1079_s28   ;;  %s1079_s28 = sphi %s1142_s28, %s25_s28   ;;  %s1075_s27 = sphi %s1140_s27, %s1397_s27   ;;  %s1071_s26 = sphi %s1138_s26, %s1396_s26   ;;  %s1067_s25 = sphi %s1136_s25, %s1395_s25   ;;  %s1063_s24 = sphi %s1134_s24, %s1394_s24   ;;  %s1059_s23 = sphi %s1132_s23, %s1389_s23   ;;  %s1055_s22 = sphi %s1130_s22, %s1393_s22   ;;  %s1051_s21 = sphi %s1128_s21, %s1392_s21  }
   0xe   : > { %1370 = sst [smem:[#allocation13_spill]] %s1059_s23  ;;  %s797_s30 = sadd.s32 4294967294, %s1079_s28  }
   0xf   : > { %1371 = sst [smem:[#allocation14_spill]] %s1063_s24  ;;  %s34_s7 = sadd.s32 1, %s1071_s26 }
  0x10   : > { %p35_p0 = scmp.ge.s32.totalorder %s34_s7, 2  ;;  %s37_s8 = sadd.s32 1, %s1075_s27 }
  0x11   : > { %p53_p1 = scmp.ne.s32.totalorder %s1059_s23, %s1055_s22  ;;  %p54_p2 = scmp.eq.s32.totalorder %s1079_s28, 0 }
  0x12   : > { %s1399_s7 = smov (%p35_p0, %s34_s7), 0  ;;  %s1401_s8 = smov (!%p35_p0, %s37_s8), %s1075_s27 }
  0x13   : > { %1372 = sst [smem:[#allocation15_spill]] %s1399_s7  ;;  %s42_s9 = ssub.s32 %s1071_s26, %s1399_s7 }
  0x14   : > { %p1180_p3 = por %p54_p2, %p53_p1  ;;  %p39_p4 = scmp.ge.s32.totalorder %s1401_s8, 2 }
  0x15   : > { %p87_p5 = scmp.ne.s32.totalorder %s1055_s22, %s1051_s21  ;;  %p88_p6 = scmp.eq.s32.totalorder %s796_s29, 0 }
  0x16   : > { %p219_p7 = scmp.eq.s32.totalorder %s796_s29, 3  ;;  %s1403_s8 = smov (%p39_p4, %s1401_s8), 0 }
  0x17   : > { %1374 = sst [smem:[#allocation16_spill]] %s1403_s8  ;;  %p1188_p8 = por %p88_p6, %p87_p5 }
  0x18   : > { %p1192_p9 = por %p219_p7, %p53_p1  ;;  %s41_s13 = ssub.s32 %s1075_s27, %s1403_s8 }
  0x19   : > { %p225_p10 = scmp.eq.s32.totalorder %s797_s30, 3  ;;  %s43_s14 = sor.u32 %s42_s9, %s41_s13 }
  0x1a   : > { %s1376_s12 = scalar_select %p1192_p9, 1, 0 }
  0x1b   : > { %s46_s15 = sadd.s32 1, %s1059_s23  ;;  %p44_p11 = scmp.eq.s32.totalorder %s43_s14, 0 }
  0x1c   : > { %1377 = sst [smem:[#allocation17_spill]] %s1376_s12  ;;  %p1199_p12 = por %p225_p10, %p87_p5 }
  0x1d   : > { %s1204_s17 = scalar_select %p44_p11, %s1059_s23, %s46_s15  }
  0x1e   : > { %s1378_s16 = scalar_select %p1199_p12, 1, 0 }
  0x1f   : > { %1380 = sst [smem:[#allocation19_spill]] %s1204_s17  ;;  %p799_p13 = scmp.ge.s32.totalorder %s1079_s28, 4 }
  0x20   : > { %1379 = sst [smem:[#allocation18_spill]] %s1378_s16 }
  0x21   : > { %241 = sbr.rel (%p799_p13) target bundleno = 83 (0x53), region = 16 }
  0x26   : > { %244 = sbr.rel (!%p1180_p3) target bundleno = 49 (0x31), region = 20  ;;  %s246_s18 = sand.u32 (%p1180_p3), 1, %s1059_s23  }
  0x27   : > { %s801_s19 = sshll.u32 (%p1180_p3), %s1071_s26, 1  ;;  %s800_s20 = sshll.u32 (%p1180_p3), %s246_s18, 4 }
  0x28   : > { %s802_s29 = sshll.u32 (%p1180_p3), %s1075_s27, 3  ;;  %s1381_s0 = sld [smem:[#allocation20_spill]] (%p1180_p3) }
  0x29   : > { %s251_s30 = sadd.s32 (%p1180_p3), %s802_s29, %s801_s19  ;;  %s248_s8 = scalar_lea.vmem (%p1180_p3), [#allocation2], %s800_s20 }
  0x2a   : > { %s803_s9 = sshll.u32 (%p1180_p3), %s251_s30, 2 }
  0x2e   : > { %s253_s15 = scalar_lea.vmem %s1381_s0, %s803_s9 }
  0x2f   : > { %v284_v0 = vld [vmem:[%s253_s15] sm:$0xff]  ;;  %v286_v1 = vld [vmem:[%s253_s15 + $0x10] sm:$0xff] }
  0x30   : > { %285 = vst [vmem:[%s248_s8] sm:$0xff] %v284_v0  ;;  %287 = vst [vmem:[%s248_s8 + $0x8] sm:$0xff] %v286_v1 }
  0x31 PF: > { %s1216_s7 = sand.u32 1, %s1059_s23   ;;  %s805_s18 = sshll.u32 %s1071_s26, 1 }
  0x32   : > { %s804_s19 = sshll.u32 %s1216_s7, 5  ;;  %s806_s29 = sshll.u32 %s1075_s27, 4 }
  0x33   : > { %s304_s30 = sadd.s32 %s806_s29, %s805_s18  ;;  %s298_s20 = scalar_lea.vmem [#allocation3], %s804_s19 }
  0x34   : > { %s307_s9 = sshll.u32 %s298_s20, 4  ;;  %s807_s8 = sshll.u32 %s304_s30, 6  ;;  %s308_s9 = int_to_ptr.vmem [resolvable:$true] %s307_s9 }
  0x35   : > { %s1382_s1 = sld [smem:[#allocation21_spill]]  ;;  %s295_s0 = scalar_lea.sflag [#allocation4], %s1216_s7 }
  0x36   : > { %s939_s17 = scalar_lea.vmem %s308_s9, 512  ;;  %s1081_s23 = smov [#allocation3]  }
  0x37   : > { %p940_p0 = scmp.ne.s32.totalorder %s308_s9, %s939_s17  ;;  %s943_s16 = sshll.u32 %s1081_s23, 4  ;;  %s944_s16 = int_to_ptr.vmem [resolvable:$false] %s943_s16 }
  0x38   : > { %s945_s21 = scalar_lea.vmem %s944_s16, 1024  ;;  %p946_p4 = scmp.lt.s32.totalorder %s308_s9, %s944_s16 }
  0x39   : > { %p941_p1 = pnand %p940_p0, %p1180_p3  ;;  %p947_p5 = scmp.lt.s32.totalorder %s945_s21, %s939_s17 }
  0x3b   : > { %s306_s15 = scalar_lea.hbm %s1382_s1, %s807_s8  ;;  %p942_p2 = pneg %p941_p1 }
  0x3c   : > { %p948_p6 = por %p947_p5, %p946_p4 }
  0x3e   : > { %p949_p7 = pnand %p948_p6, %p942_p2 }
  0x40   : > { %952 = shalt.err (!%p949_p7)
}
  0x41   : > { %s1082_s29 = smov 256   ;;  %s1083_s30 = smov 128  }
  0x42   : > { %s1084_s20 = smov 8   ;;  %s810_s23 = sshll.u32 %s1075_s27, 3 }
  0x43   : > { %840 = dma.hbm_to_vmem [thread:$0]  (%p1180_p3), %s306_s15, 512, %s308_s9, %s295_s0, %s1082_s29, %s1083_s30, %s1084_s20  }
  0x44   : > { %s321_s8 = scalar_lea.vmem [#allocation6], %s804_s19  ;;  %s327_s21 = sadd.s32 %s810_s23, %s805_s18 }
  0x45   : > { %s330_s16 = sshll.u32 %s321_s8, 4  ;;  %s811_s17 = sshll.u32 %s327_s21, 7  ;;  %s331_s16 = int_to_ptr.vmem [resolvable:$true] %s330_s16 }
  0x46   : > { %s329_s1 = scalar_lea.hbm %s1353_s2, %s811_s17  ;;  %s318_s6 = scalar_lea.sflag [#allocation7], %s1216_s7 }
  0x47   : > { %s965_s12 = scalar_lea.vmem %s331_s16, 512  ;;  %s1085_s24 = smov [#allocation6]  }
  0x48   : > { %p966_p10 = scmp.ne.s32.totalorder %s331_s16, %s965_s12  ;;  %s969_s0 = sshll.u32 %s1085_s24, 4  ;;  %s970_s0 = int_to_ptr.vmem [resolvable:$false] %s969_s0 }
  0x49   : > { %s971_s9 = scalar_lea.vmem %s970_s0, 1024  ;;  %p972_p0 = scmp.lt.s32.totalorder %s331_s16, %s970_s0 }
  0x4a   : > { %p967_p11 = pnand %p966_p10, %p1180_p3  ;;  %p973_p1 = scmp.lt.s32.totalorder %s971_s9, %s965_s12 }
  0x4c   : > { %p968_p13 = pneg %p967_p11  ;;  %p974_p2 = por %p973_p1, %p972_p0 }
  0x4e   : > { %p975_p4 = pnand %p974_p2, %p968_p13 }
  0x50   : > { %978 = shalt.err (!%p975_p4)
}
  0x51   : > { %s1086_s18 = smov 512   ;;  %s1087_s19 = smov 16  }
  0x52   : > { %841 = dma.hbm_to_vmem [thread:$0]  (%p1180_p3), %s329_s1, 512, %s331_s16, %s318_s6, %s1086_s18, %s1082_s29, %s1087_s19  }
  0x53 PF: > { %p812_p5 = scmp.ge.s32.totalorder %s1079_s28, 1  ;;  %p362_p6 = scmp.lt.s32.totalorder %s1079_s28, 5 }
  0x55   : > { %p363_p7 = pnand %p812_p5, %p362_p6 }
  0x56   : > { %s1251_s24 = sand.u32 (!%p363_p7), 1, %s1055_s22  }
  0x57   : > { %366 = sbr.rel (%p363_p7) target bundleno = 329 (0x149), region = 78  ;;  %s813_s7 = sshll.u32 (!%p363_p7), %s1251_s24, 4 }
  0x58   : > { %s1255_s12 = sshll.u32 (!%p363_p7), %s1251_s24, 5  ;;  %s1257_s10 = scalar_lea.vmem (!%p363_p7), [#allocation2], %s813_s7 }
  0x59   : > { %s376_s1 = scalar_lea.sflag (!%p363_p7), [#allocation4], %s1251_s24  ;;  %s379_s6 = scalar_lea.vmem (!%p363_p7), [#allocation3], %s1255_s12 }
  0x5c   : > { %1038 = dma.done.wait (%p1188_p8), %s376_s1, 512  }
  0x5d   : > { %1040 = vsyncadd (%p1188_p8), %s376_s1, 4294966784  ;;  %s385_s15 = scalar_lea.sflag [#allocation7], %s1251_s24  ;;  %s1267_s29 = scalar_lea.vmem [#allocation6], %s1255_s12 }
  0x5e   : > { %1042 = dma.done.wait (%p1188_p8), %s385_s15, 512  }
  0x5f   : > { %1044 = vsyncadd (%p1188_p8), %s385_s15, 4294966784  ;;  %p444_p3 = scmp.lt.s32.totalorder %s1067_s25, 1  ;;  %v1088_v2 = vmov 0   ;;  %v487_v3 = vld [vmem:[%s379_s6] sm:$0xff]  ;;  %v823_v4 = vld [vmem:[%s379_s6 + $0x8] sm:$0xff]  ;;  %vm525_vm0 = vcmask 1043456  }
  0x60   : > { %564 = vmatprep.mubr.bf16.mxu0 %v1088_v2  ;;  %924 = vset.pattern.permute.xlu0 %v1088_v2  ;;  %v824_v5 = vld [vmem:[%s379_s6 + $0x10] sm:$0xff]  ;;  %v490_v6 = vmax.bf16 %v823_v4, %v487_v3  ;;  %v825_v7 = vld [vmem:[%s379_s6 + $0x18] sm:$0xff]  ;;  %vm521_vm1 = vcmask 64512   ;;  %v579_v29 = vld [vmem:[%s1267_s29] sm:$0xff]  ;;  %s1383_s18 = sld [smem:[#allocation14_spill]]  ;;  %s833_s7 = sshll.u32 %s1067_s25, 3 }
  0x61   : > { %s445_s30 = scalar_select %p444_p3, %s1067_s25, 1  ;;  %925 = vset.pattern.permute.xlu1 %v1088_v2  ;;  %v495_v8 = vmax.bf16 %v825_v7, %v824_v5  ;;  %v461_v18 = vld [vmem:[%s1257_s10] sm:$0xff]  ;;  %v462_v22 = vld [vmem:[%s1257_s10 + $0x8] sm:$0xff]  ;;  %v583_v35 = vmul.f32 0.5, %v579_v29 }
  0x62   : > { %v463_v19 = vunpack.c.l.bf16 %v461_v18  ;;  %v464_v21 = vunpack.c.h.bf16 %v461_v18  ;;  %v465_v25 = vunpack.c.l.bf16 %v462_v22  ;;  %v466_v27 = vunpack.c.h.bf16 %v462_v22  ;;  %v580_v31 = vld [vmem:[%s1267_s29 + $0x8] sm:$0xff]  ;;  %v581_v41 = vld [vmem:[%s1267_s29 + $0x10] sm:$0xff]  ;;  %v582_v47 = vld [vmem:[%s1267_s29 + $0x18] sm:$0xff]  ;;  %s440_s1 = scalar_lea.vmem [#allocation8], %s1255_s12  ;;  %s1089_s16 = smov [#allocation8]  }
  0x63   : > { %s838_s20 = sshll.u32 %s445_s30, 3  ;;  %s837_s23 = sshll.u32 %s445_s30, 4  ;;  %v496_v11 = vmax.bf16 %v495_v8, %v490_v6  ;;  %v584_v37 = vmul.f32 0.5, %v580_v31  ;;  %v585_v50 = vmul.f32 0.5, %v581_v41  ;;  %v586_v57 = vmul.f32 0.5, %v582_v47 }
  0x64   : > { %s448_s21 = scalar_lea.vmem %s1354_s3, %s837_s23  ;;  %s458_s14 = scalar_lea.vmem %s1356_s5, %s837_s23 }
  0x65   : > { %s453_s9 = scalar_lea.vmem %s1355_s4, %s838_s20  ;;  %v467_v9 = vld [vmem:[%s448_s21] sm:$0xff]  ;;  %v468_v12 = vld [vmem:[%s448_s21 + $0x8] sm:$0xff]  ;;  %v828_v14 = vcombine.high %v496_v11, %v496_v11  ;;  %v827_v15 = vcombine.low %v496_v11, %v496_v11  ;;  %s623_s6 = sshll.u32 %s440_s1, 4  ;;  %s1293_s6 = int_to_ptr.vmem [resolvable:$true] %s623_s6 }
  0x66   : > { %v499_v10 = vld [vmem:[%s458_s14] sm:$0xff]  ;;  %471 = vperm.xlu0 %924, %v467_v9   ;;  %v500_v13 = vld [vmem:[%s458_s14 + $0x8] sm:$0xff]  ;;  %s832_s19 = sshll.u32 %s1383_s18, 1  ;;  %s1385_s30 = sld [smem:[#allocation22_spill]] }
  0x67   : > { %503 = vperm.xlu1 %925, %v499_v10   ;;  %829 = vmatprep.subr.msk.bf16.mxu0 %vm525_vm0, %v828_v14  ;;  %v527_v16 = vsel %vm525_vm0, %v827_v15, 0  ;;  %v926_v17 = vld [vmem:[%s453_s9] sm:$0xff]   ;;  %s620_s10 = sadd.s32 %s833_s7, %s832_s19  ;;  %s608_s23 = scalar_lea.sflag [#allocation5], %s1251_s24 }
  0x68   : > { %547 = vmatpush1.bf16.msra.mxu0 %v527_v16  ;;  %s834_s15 = sshll.u32 %s620_s10, 7  ;;  %s979_s8 = scalar_lea.vmem %s1293_s6, 512 }
  0x69   : > { %p980_p8 = scmp.ne.s32.totalorder %s1293_s6, %s979_s8  ;;  %s983_s21 = sshll.u32 %s1089_s16, 4  ;;  %s984_s21 = int_to_ptr.vmem [resolvable:$false] %s983_s21 }
  0x6a   : > { %476 = vperm.xlu0 %924, %v468_v12   ;;  %s985_s17 = scalar_lea.vmem %s984_s21, 1024  ;;  %p986_p13 = scmp.lt.s32.totalorder %s1293_s6, %s984_s21 }
  0x6b   : > { %508 = vperm.xlu1 %925, %v500_v13   ;;  %830 = vmatmul.mubr.msk.bf16.vlgmr.msra.gmra.mxu0 %vm521_vm1, %v926_v17  ;;  %p981_p10 = pnand %p980_p8, %p1192_p9  ;;  %p987_p0 = scmp.lt.s32.totalorder %s985_s17, %s979_s8 }
  0x6c   : > { %s1298_s20 = scalar_lea.hbm %s1385_s30, %s834_s15 }
  0x6d   : > { %p982_p11 = pneg %p981_p10  ;;  %p988_p1 = por %p987_p0, %p986_p13 }
  0x6f   : > { %p989_p2 = pnand %p988_p1, %p982_p11 }
  0xe1   : > { %v472_v20 = vpop.permute.xlu0 %471 }
  0xe2   : > { %v479_v23 = vadd.f32 %v472_v20, %v463_v19  ;;  %v480_v24 = vadd.f32 %v472_v20, %v464_v21  ;;  %v504_v33 = vpop.permute.xlu1 %503 }
  0xe4   : > { %v483_v28 = vmax.f32 %v479_v23, 0.0  ;;  %v484_v30 = vmax.f32 %v480_v24, 0.0 }
  0xe5   : > { %v477_v26 = vpop.permute.xlu0 %476 }
  0xe6   : > { %v481_v32 = vadd.f32 %v477_v26, %v465_v25  ;;  %v482_v34 = vadd.f32 %v477_v26, %v466_v27  ;;  %v587_v36 = vmul.f32 0.25, %v483_v28  ;;  %v588_v38 = vmul.f32 0.25, %v484_v30  ;;  %v509_v51 = vpop.permute.xlu1 %508 }
  0xe8   : > { %v485_v42 = vmax.f32 %v481_v32, 0.0  ;;  %v486_v43 = vmax.f32 %v482_v34, 0.0  ;;  %v591_v45 = vadd.f32 %v587_v36, %v583_v35  ;;  %v592_v49 = vadd.f32 %v588_v38, %v584_v37 }
  0xea   : > { %v589_v54 = vmul.f32 0.25, %v485_v42  ;;  %v590_v58 = vmul.f32 0.25, %v486_v43 }
  0xec   : > { %v593_v0 = vadd.f32 %v589_v54, %v585_v50  ;;  %v594_v4 = vadd.f32 %v590_v58, %v586_v57 }
 0x12b   : > { %v566_v39 = vpop.f32.mrf.mxu0 }
 0x12c   : > { %v567_v40 = vadd.f32 %v566_v39, %v504_v33 }
 0x12d   : > { %v568_v44 = vpop.f32.mrf.mxu0 }
 0x12e   : > { %v575_v46 = vmax.f32 %v567_v40, 0.0  ;;  %v569_v48 = vadd.f32 %v568_v44, %v504_v33 }
 0x12f   : > { %v570_v52 = vpop.f32.mrf.mxu0 }
 0x130   : > { %v595_v53 = vmul.f32 0.25, %v575_v46  ;;  %v576_v55 = vmax.f32 %v569_v48, 0.0  ;;  %v571_v56 = vadd.f32 %v570_v52, %v509_v51 }
 0x131   : > { %v572_v59 = vpop.f32.mrf.mxu0 }
 0x132   : > { %v599_v60 = vadd.f32 %v595_v53, %v591_v45  ;;  %v596_v61 = vmul.f32 0.25, %v576_v55  ;;  %v577_v62 = vmax.f32 %v571_v56, 0.0  ;;  %v573_v63 = vadd.f32 %v572_v59, %v509_v51 }
 0x134   : > { %603 = vst [vmem:[%s440_s1] sm:$0xff] %v599_v60  ;;  %v600_v1 = vadd.f32 %v596_v61, %v592_v49  ;;  %v597_v2 = vmul.f32 0.25, %v577_v62  ;;  %v578_v3 = vmax.f32 %v573_v63, 0.0 }
 0x136   : > { %604 = vst [vmem:[%s440_s1 + $0x8] sm:$0xff] %v600_v1  ;;  %v601_v5 = vadd.f32 %v597_v2, %v593_v0  ;;  %v598_v6 = vmul.f32 0.25, %v578_v3 }
 0x138   : > { %605 = vst [vmem:[%s440_s1 + $0x10] sm:$0xff] %v601_v5  ;;  %v602_v7 = vadd.f32 %v598_v6, %v594_v4 }
 0x13a   : > { %606 = vst [vmem:[%s440_s1 + $0x18] sm:$0xff] %v602_v7 }
 0x13b   : > { %992 = shalt.err (!%p989_p2)
}
 0x13c   : > { %s993_s13 = scalar_lea.hbm %s1298_s20, 512  ;;  %s997_s0 = scalar_lea.hbm %s1385_s30, 2048 }
 0x13d   : > { %p994_p4 = scmp.ne.s32.totalorder %s1298_s20, %s993_s13  ;;  %p998_p7 = scmp.lt.s32.totalorder %s1298_s20, %s1385_s30 }
 0x13e   : > { %p999_p3 = scmp.lt.s32.totalorder %s997_s0, %s993_s13 }
 0x13f   : > { %p995_p5 = pnand %p994_p4, %p1192_p9 }
 0x140   : > { %p1000_p8 = por %p999_p3, %p998_p7 }
 0x141   : > { %p996_p6 = pneg %p995_p5 }
 0x143   : > { %p1001_p10 = pnand %p1000_p8, %p996_p6 }
 0x145   : > { %1004 = shalt.err (!%p1001_p10)
}
 0x146   : > { %s1090_s19 = smov 256   ;;  %s1091_s7 = smov 512  }
 0x147   : > { %s1092_s10 = smov 16  }
 0x148   : > { %844 = dma.vmem_to_hbm [thread:$0]  (%p1192_p9), %s1293_s6, 512, %s1298_s20, %s608_s23, %s1090_s19, %s1091_s7, %s1092_s10  }
 0x149 PF: > { %s1386_s1 = sld [smem:[#allocation12_spill]]  ;;  %p850_p11 = scmp.ge.s32.totalorder %s1079_s28, 2 }
 0x14b   : > { %p847_p13 = pnand %p850_p11, %p1199_p12 }
 0x14d   : > { %p848_p0 = pneg %p847_p13 }
 0x14f   : > { %s638_s29 = sand.u32 1, %s1386_s1  }
 0x150   : > { %s639_s12 = scalar_lea.sflag [#allocation5], %s638_s29 }
 0x151   : > { %1046 = dma.done.wait (%p848_p0), %s639_s12, 512  }
 0x152   : > { %1048 = vsyncadd (%p848_p0), %s639_s12, 4294966784  ;;  %s25_s28 = sadd.s32 1, %s1079_s28   ;;  %s1388_s8 = sld [smem:[#allocation13_spill]] }
 0x153   : > { %p22_p1 = scmp.ge.s32.totalorder %s25_s28, 6   ;;  %s1389_s23 = sld [smem:[#allocation19_spill]] }
 0x154   : > { %s1390_s6 = sld [smem:[#allocation15_spill]]  ;;  %s1392_s21 = smov %s1055_s22 }
 0x155   : > { %s1391_s20 = sld [smem:[#allocation16_spill]]  ;;  %s1394_s24 = smov %s1071_s26 }
 0x156   : > { %s1395_s25 = smov %s1075_s27 }
 0x157   :  { %24 = sbr.rel (!%p22_p1) target bundleno = 13 (0xd), region = 160 }
 0x158   : > { %s1393_s22 = smov %s1388_s8 }
 0x15a   : > { %s1396_s26 = smov %s1390_s6 }
 0x15b   : > { %s1397_s27 = smov %s1391_s20 }
 0x15c   :  { %644 = vsyncpa [#allocation4], 1 }
 0x15d   :  { %646 = vsyncpa [#allocation4 + $0x1], 1 }
 0x15e   :  { %647 = vsyncpa [#allocation7], 1 }
 0x15f   :  { %649 = vsyncpa [#allocation7 + $0x1], 1 }
 0x160   :  { %650 = vsyncpa [#allocation5], 1 }
 0x161   :  { %652 = vsyncpa [#allocation5 + $0x1], 1 }

</bundles_post_ra>
